<compile_context>
chip_gen: v6e
topology: v6e:2x2x1
jax: 0.10.0
libtpu: 0.0.40
codegen_flags: <defaults>
</compile_context>

<pallas_src>
import functools
import math

import jax
import jax.numpy as jnp
import numpy as np
from jax import lax
from jax.experimental import pallas as pl
from jax.experimental.pallas import tpu as pltpu


def _round_up(n: int, m: int) -> int:
    return ((n + m - 1) // m) * m


_COMPILER_PARAMS = pltpu.CompilerParams(
    dimension_semantics=("parallel",),
    vmem_limit_bytes=32 * 1024 * 1024,  # >= v5e default 16 MiB, safe for v7x's 32 MiB scoped
)

_HIGHEST = jax.lax.Precision.HIGHEST


# ----------------------------------------------------------------------------
# Kernel 1: pre-aggregation MLP  y = relu(x @ W^T)   (for mean_nn / pool_nn)
# ----------------------------------------------------------------------------
def _linear_relu_kernel(x_ref, w_ref, o_ref):
    y = jnp.dot(
        x_ref[...].astype(jnp.float32),
        w_ref[...].astype(jnp.float32),
        preferred_element_type=jnp.float32,
        precision=_HIGHEST,
    )
    o_ref[...] = jnp.maximum(y, 0.0).astype(o_ref.dtype)


def linear_relu(x, w_t, *, tile_n):
    n_pad, d_in = x.shape
    d_out = w_t.shape[1]
    grid = (n_pad // tile_n,)
    return pl.pallas_call(
        _linear_relu_kernel,
        out_shape=jax.ShapeDtypeStruct((n_pad, d_out), jnp.float32),
        grid_spec=pltpu.PrefetchScalarGridSpec(
            num_scalar_prefetch=0,
            grid=grid,
            in_specs=[
                pl.BlockSpec((tile_n, d_in), lambda i: (i, 0)),
                pl.BlockSpec((d_in, d_out), lambda i: (0, 0)),
            ],
            out_specs=pl.BlockSpec((tile_n, d_out), lambda i: (i, 0)),
        ),
        compiler_params=_COMPILER_PARAMS,
    )(x, w_t)


# ----------------------------------------------------------------------------
# Kernel 2: fused gather + neighbourhood aggregation (mean or max)
#   - neighbour ids / degrees are scalar-prefetched into SMEM
#   - the full source-node feature table is kept resident in VMEM
# ----------------------------------------------------------------------------
def _agg_kernel(nbr_ref, deg_ref, hn_ref, o_ref, *, max_deg, mode):
    # nbr_ref: SMEM (N_dst_pad * max_deg,) int32  flattened padded neighbour lists
    # deg_ref: SMEM (N_dst_pad,)           int32  in-degree per destination node
    # hn_ref:  VMEM (N_src, D)                    source-node feature table
    # o_ref:   VMEM (tile_n, D)                   aggregated neighbour features
    i = pl.program_id(0)
    tile_n, d = o_ref.shape

    def row_body(r, carry):
        node = i * tile_n + r
        deg = deg_ref[node]

        if mode == "max":
            init = jnp.full((1, d), -jnp.inf, dtype=jnp.float32)
        else:
            init = jnp.zeros((1, d), dtype=jnp.float32)

        def nb_body(k, acc):
            idx = nbr_ref[node * max_deg + k]
            row = hn_ref[pl.ds(idx, 1), :].astype(jnp.float32)
            if mode == "max":
                return jnp.maximum(acc, row)
            return acc + row

        acc = lax.fori_loop(0, deg, nb_body, init)

        if mode == "max":
            res = jnp.where(deg > 0, acc, 0.0)  # zero-in-degree nodes -> 0
        else:
            res = acc / jnp.maximum(deg, 1).astype(jnp.float32)

        o_ref[pl.ds(r, 1), :] = res.astype(o_ref.dtype)
        return carry

    lax.fori_loop(0, tile_n, row_body, 0)


def aggregate(nbr_flat, deg, h_neigh, *, mode, tile_n):
    n_pad = deg.shape[0]
    max_deg = nbr_flat.shape[0] // n_pad
    n_src, d = h_neigh.shape
    grid = (n_pad // tile_n,)
    kernel = functools.partial(_agg_kernel, max_deg=max_deg, mode=mode)
    return pl.pallas_call(
        kernel,
        out_shape=jax.ShapeDtypeStruct((n_pad, d), jnp.float32),
        grid_spec=pltpu.PrefetchScalarGridSpec(
            num_scalar_prefetch=2,  # nbr_flat, deg -> SMEM, fused in-kernel gather
            grid=grid,
            in_specs=[pl.BlockSpec((n_src, d), lambda i, nbr, dg: (0, 0))],
            out_specs=pl.BlockSpec((tile_n, d), lambda i, nbr, dg: (i, 0)),
        ),
        compiler_params=_COMPILER_PARAMS,
    )(nbr_flat, deg, h_neigh)


# ----------------------------------------------------------------------------
# Kernel 3: node update  z = relu(h_self @ Ws^T + h_agg @ Wn^T) (+ L2 norm)
# ----------------------------------------------------------------------------
def _update_kernel(hs_ref, ha_ref, ws_ref, wn_ref, o_ref, *, norm):
    zs = jnp.dot(
        hs_ref[...].astype(jnp.float32), ws_ref[...].astype(jnp.float32),
        preferred_element_type=jnp.float32, precision=_HIGHEST,
    )
    zn = jnp.dot(
        ha_ref[...].astype(jnp.float32), wn_ref[...].astype(jnp.float32),
        preferred_element_type=jnp.float32, precision=_HIGHEST,
    )
    z = jnp.maximum(zs + zn, 0.0)
    if norm:
        s = jnp.sum(z * z, axis=-1, keepdims=True)
        s_safe = jnp.where(s > 0.0, s, 1.0)          # zero-norm rows divide by 1
        z = z * lax.rsqrt(s_safe)                    # EUP rsqrt on (tile, 1) column
    o_ref[...] = z.astype(o_ref.dtype)


def node_update(h_self, h_agg, w_self_t, w_neigh_t, *, norm, tile_n):
    n_pad, d_self = h_self.shape
    _, d_neigh = h_agg.shape
    out_feats = w_self_t.shape[1]
    grid = (n_pad // tile_n,)
    kernel = functools.partial(_update_kernel, norm=norm)
    return pl.pallas_call(
        kernel,
        out_shape=jax.ShapeDtypeStruct((n_pad, out_feats), jnp.float32),
        grid_spec=pltpu.PrefetchScalarGridSpec(
            num_scalar_prefetch=0,
            grid=grid,
            in_specs=[
                pl.BlockSpec((tile_n, d_self), lambda i: (i, 0)),
                pl.BlockSpec((tile_n, d_neigh), lambda i: (i, 0)),
                pl.BlockSpec((d_self, out_feats), lambda i: (0, 0)),
                pl.BlockSpec((d_neigh, out_feats), lambda i: (0, 0)),
            ],
            out_specs=pl.BlockSpec((tile_n, out_feats), lambda i: (i, 0)),
        ),
        compiler_params=_COMPILER_PARAMS,
    )(h_self, h_agg, w_self_t, w_neigh_t)


# ----------------------------------------------------------------------------
# ConvLayer port
# ----------------------------------------------------------------------------
class ConvLayerPallas:
    """Pallas TPU port of the PyTorch ConvLayer (SAGEConv-like) forward pass."""

    def __init__(self, in_feats, out_feats, dropout, aggregator_type, norm, *, key):
        self._in_neigh_feats, self._in_self_feats = in_feats
        self._out_feats = out_feats
        self._aggre_type = aggregator_type
        self._dropout = dropout
        self.norm = norm

        gain = math.sqrt(2.0)  # nn.init.calculate_gain('relu')
        k_self, k_neigh, k_pre = jax.random.split(key, 3)

        def xavier(k, shape):  # torch Linear layout: (out_features, in_features)
            fan_out, fan_in = shape
            bound = gain * math.sqrt(6.0 / (fan_in + fan_out))
            return jax.random.uniform(k, shape, jnp.float32, -bound, bound)

        self.w_self = xavier(k_self, (out_feats, self._in_self_feats))
        self.w_neigh = xavier(k_neigh, (out_feats, self._in_neigh_feats))
        if aggregator_type in ("pool_nn", "pool_nn_edge", "mean_nn", "mean_nn_edge"):
            self.w_preagg = xavier(k_pre, (self._in_neigh_feats, self._in_neigh_feats))
        # TODO(synk): 'lstm'/'lstm_edge' (degree-bucketed nn.LSTM mailbox reducer) has no
        #             clean Pallas equivalent and is not implemented.
        # TODO(synk): '*_edge' variants (u_mul_e with edge 'occurrence') are not wired up.
        # TODO(synk): training-mode dropout (pltpu.prng_* in-kernel); forward here follows
        #             eval semantics (dropout == identity).

    def __call__(self, graph, x, *, tile_n=256):
        h_neigh, h_self = x
        if self._aggre_type not in ("mean", "mean_nn", "pool_nn"):
            raise KeyError(
                "Aggregator type {} not implemented in Pallas port.".format(self._aggre_type)
            )

        n_src = h_neigh.shape[0]
        n_dst = h_self.shape[0]
        nbr = graph["nbr"]   # (n_dst, max_deg) int32, padded with 0
        deg = graph["deg"]   # (n_dst,) int32

        # -- optional pre-aggregation MLP on the source-node table ------------
        if self._aggre_type in ("mean_nn", "pool_nn"):
            tile_src = min(tile_n, _round_up(n_src, 8))
            n_src_pad = _round_up(n_src, tile_src)
            hn = jnp.pad(h_neigh, ((0, n_src_pad - n_src), (0, 0)))
            hn = linear_relu(hn, self.w_preagg.T, tile_n=tile_src)[:n_src]
        else:
            hn = h_neigh

        # -- fused gather + aggregation over in-neighbours ---------------------
        tile_dst = min(tile_n, _round_up(n_dst, 8))
        n_dst_pad = _round_up(n_dst, tile_dst)
        pad = n_dst_pad - n_dst
        nbr_flat = jnp.pad(nbr, ((0, pad), (0, 0))).reshape(-1).astype(jnp.int32)
        deg_pad = jnp.pad(deg, (0, pad)).astype(jnp.int32)
        mode = "max" if self._aggre_type == "pool_nn" else "mean"
        h_agg = aggregate(nbr_flat, deg_pad, hn, mode=mode, tile_n=tile_dst)

        # -- z = relu(fc_self(h_self) + fc_neigh(h_agg)); optional L2 norm -----
        hs = jnp.pad(h_self, ((0, pad), (0, 0)))
        z = node_update(
            hs, h_agg, self.w_self.T, self.w_neigh.T,
            norm=bool(self.norm), tile_n=tile_dst,
        )
        return z[:n_dst]


# ----------------------------------------------------------------------------
# Host-side graph prep + pure-JAX reference for correctness checking
# ----------------------------------------------------------------------------
def build_graph(src_ids, dst_ids, num_dst):
    src = np.asarray(src_ids).tolist()
    dst = np.asarray(dst_ids).tolist()
    buckets = [[] for _ in range(num_dst)]
    for s, d in zip(src, dst):
        buckets[d].append(s)
    max_deg = max(1, max(len(b) for b in buckets))
    nbr = np.zeros((num_dst, max_deg), dtype=np.int32)
    deg = np.zeros((num_dst,), dtype=np.int32)
    for d, b in enumerate(buckets):
        deg[d] = len(b)
        if b:
            nbr[d, : len(b)] = np.asarray(b, dtype=np.int32)
    return {"nbr": jnp.asarray(nbr), "deg": jnp.asarray(deg)}


def reference_forward(layer, graph, x):
    h_neigh, h_self = x
    if layer._aggre_type in ("mean_nn", "pool_nn"):
        h_neigh = jax.nn.relu(
            jnp.dot(h_neigh, layer.w_preagg.T, precision=_HIGHEST)
        )
    nbr, deg = graph["nbr"], graph["deg"]
    gathered = h_neigh[nbr]                                      # (N_dst, max_deg, D)
    mask = jnp.arange(nbr.shape[1])[None, :] < deg[:, None]
    if layer._aggre_type == "pool_nn":
        neg = jnp.where(mask[:, :, None], gathered, -jnp.inf)
        agg = jnp.where(deg[:, None] > 0, jnp.max(neg, axis=1), 0.0)
    else:
        agg = jnp.sum(jnp.where(mask[:, :, None], gathered, 0.0), axis=1)
        agg = agg / jnp.maximum(deg, 1)[:, None].astype(jnp.float32)
    z = (jnp.dot(h_self, layer.w_self.T, precision=_HIGHEST)
         + jnp.dot(agg, layer.w_neigh.T, precision=_HIGHEST))
    z = jax.nn.relu(z)
    if layer.norm:
        n = jnp.linalg.norm(z, axis=1, keepdims=True)
        n = jnp.where(n == 0.0, 1.0, n)
        z = z / n
    return z


if __name__ == "__main__":
    key = jax.random.PRNGKey(0)
    k_hn, k_hs, k_src, k_dst, k_layer = jax.random.split(key, 5)

    num_src, num_dst = 16, 16
    d_neigh, d_self, out_feats = 32, 32, 32
    num_edges = 64

    h_neigh = jax.random.normal(k_hn, (num_src, d_neigh), dtype=jnp.float32)
    h_self = jax.random.normal(k_hs, (num_dst, d_self), dtype=jnp.float32)
    src_ids = jax.random.randint(k_src, (num_edges,), 0, num_src, dtype=jnp.int32)
    dst_ids = jax.random.randint(k_dst, (num_edges,), 0, num_dst, dtype=jnp.int32)
    graph = build_graph(src_ids, dst_ids, num_dst)

    for aggre in ("mean", "mean_nn", "pool_nn"):
        layer = ConvLayerPallas(
            (d_neigh, d_self), out_feats, dropout=0.0,
            aggregator_type=aggre, norm=True, key=k_layer,
        )
        z = layer(graph, (h_neigh, h_self))
        z = jax.block_until_ready(z)
        ref = reference_forward(layer, graph, (h_neigh, h_self))
        assert z.shape == (num_dst, out_feats), (aggre, z.shape)
        assert bool(jnp.allclose(z, ref, atol=1e-3, rtol=1e-3)), aggre

    print("KERNEL_OK")
</pallas_src>

<mosaic_0001>
module attributes {stable_mosaic.version = 11 : i64} {
  func.func @_agg_kernel(%arg0: i32, %arg1: memref<112xi32, #tpu.memory_space<smem>>, %arg2: memref<16xi32, #tpu.memory_space<smem>>, %arg3: memref<16x32xf32, #tpu.memory_space<vmem>>, %arg4: memref<16x32xf32, #tpu.memory_space<vmem>>) attributes {dimension_semantics = [#tpu.dimension_semantics<parallel>], iteration_bounds = array<i64: 1>, scalar_prefetch = 2 : i64, scratch_operands = 0 : i64, tpu.core_type = #tpu.core_type<tc>, window_params = [{pipeline_mode = #tpu.pipeline_mode<synchronous>, transform_indices = @transform_0, window_bounds = array<i64: 16, 32>}, {transform_indices = @transform_1, window_bounds = array<i64: 16, 32>}]} {
    %c0_i32 = arith.constant 0 : i32
    %c16_i32 = arith.constant 16 : i32
    %0 = arith.addi %c0_i32, %c16_i32 : i32
    %c1_i32 = arith.constant 1 : i32
    scf.for %arg5 = %c0_i32 to %0 step %c1_i32  : i32 {
      %c16_i32_1 = arith.constant 16 : i32
      %1 = arith.muli %arg0, %c16_i32_1 : i32
      %2 = arith.addi %1, %arg5 : i32
      %3 = arith.index_cast %2 : i32 to index
      %4 = memref.load %arg2[%3] : memref<16xi32, #tpu.memory_space<smem>>
      %cst = arith.constant 0.000000e+00 : f32
      %5 = vector.broadcast %cst : f32 to vector<1x32xf32>
      %c0_i32_2 = arith.constant 0 : i32
      %6 = arith.subi %4, %c0_i32_2 : i32
      %7 = arith.addi %c0_i32_2, %6 : i32
      %c1_i32_3 = arith.constant 1 : i32
      %8 = scf.for %arg6 = %c0_i32_2 to %7 step %c1_i32_3 iter_args(%arg7 = %5) -> (vector<1x32xf32>)  : i32 {
        %c7_i32 = arith.constant 7 : i32
        %15 = arith.muli %2, %c7_i32 : i32
        %16 = arith.addi %15, %arg6 : i32
        %17 = arith.index_cast %16 : i32 to index
        %18 = memref.load %arg1[%17] : memref<112xi32, #tpu.memory_space<smem>>
        %19 = arith.index_cast %18 : i32 to index
        %c0_5 = arith.constant 0 : index
        %20 = vector.load %arg3[%19, %c0_5] : memref<16x32xf32, #tpu.memory_space<vmem>>, vector<1x32xf32>
        %21 = arith.addf %arg7, %20 : vector<1x32xf32>
        scf.yield %21 : vector<1x32xf32>
      }
      %c1_i32_4 = arith.constant 1 : i32
      %9 = arith.maxsi %4, %c1_i32_4 : i32
      %10 = arith.sitofp %9 : i32 to f32
      %11 = vector.broadcast %10 : f32 to vector<1x32xf32>
      %12 = arith.divf %8, %11 : vector<1x32xf32>
      %13 = arith.index_cast %arg5 : i32 to index
      %c0 = arith.constant 0 : index
      %14 = vector.load %arg4[%13, %c0] : memref<16x32xf32, #tpu.memory_space<vmem>>, vector<1x32xf32>
      tpu.vector_store %arg4[%13, %c0], %12 {strides = array<i32>} : memref<16x32xf32, #tpu.memory_space<vmem>>, vector<1x32xf32>,
    }
    %c16_i32_0 = arith.constant 16 : i32
    return
  }
  func.func @transform_0(%arg0: i32, %arg1: memref<112xi32, #tpu.memory_space<smem>>, %arg2: memref<16xi32, #tpu.memory_space<smem>>) -> (i32, i32) {
    %c0_i32 = arith.constant 0 : i32
    %c0_i32_0 = arith.constant 0 : i32
    %c0_i32_1 = arith.constant 0 : i32
    return %c0_i32, %c0_i32_0 : i32, i32
  }
  func.func @transform_1(%arg0: i32, %arg1: memref<112xi32, #tpu.memory_space<smem>>, %arg2: memref<16xi32, #tpu.memory_space<smem>>) -> (i32, i32) {
    %c0_i32 = arith.constant 0 : i32
    %c0_i32_0 = arith.constant 0 : i32
    return %arg0, %c0_i32 : i32, i32
  }
}

</mosaic_0001>

<bundles_post_ra>
// kernel: tpu_custom_call.1
= control target key start
LH: loop header
LB: loop body
LE: loop exit
PB: predicated region body
PF: predicated region fallthrough
CT: control target
= control target key end

     0   :  { %s235_s12 = smov [#allocation3]   ;;  %s290_s0 = inlined_call_operand.hbm [shape: s32[112], index: 0, kind: input, shape index: {}]   ;;  %s291_s2 = inlined_call_operand.hbm [shape: f32[16,32], index: 2, kind: input, shape index: {}]   ;;  %s292_s3 = inlined_call_operand.hbm [shape: f32[16,32], index: 3, kind: output, shape index: {}]   ;;  %s293_s1 = inlined_call_operand.vmem [shape: s32[16], index: 1, kind: input, shape index: {}]  }
   0x1   :  { %9 = dma.hbm_to_smem %s290_s0, 16, %s235_s12, [#allocation2] }
   0x2   :  { %s10_s17 = sshll.u32 %s293_s1, 4  ;;  %s11_s17 = int_to_ptr.vmem [resolvable:$true] %s10_s17 }
   0x3   :  { %s145_s18 = scalar_lea.vmem %s11_s17, 16  ;;  %p150_p1 = scmp.lt.s32.totalorder %s11_s17, %s11_s17 }
   0x4   :  { %p146_p0 = scmp.ne.s32.totalorder %s11_s17, %s145_s18  ;;  %p151_p2 = scmp.lt.s32.totalorder %s145_s18, %s145_s18 }
   0x6   :  { %p152_p3 = por %p151_p2, %p150_p1 }
   0x8   :  { %p153_p4 = pnand %p152_p3, %p146_p0 }
   0xa   :  { %156 = shalt.err (!%p153_p4)  }
   0xb   :  { %s236_s19 = smov [#allocation4]  }
   0xc   :  { %13 = dma.vmem_to_smem %s11_s17, 16, %s236_s19, [#allocation2] }
   0xd   :  { %213 = dma.done.wait [#allocation2], 32 }
   0xe   :  { %214 = vsyncadd [#allocation2], 4294967264 }
   0xf   :  { %15 = sfence }
  0x10   :  { %16 = vsyncpa [#allocation6], 0 }
  0x11   :  { %17 = vsyncpa [#allocation7], 0  ;;  %s237_s0 = smov [#allocation5]  }
  0x12   :  { %s23_s20 = sshll.u32 %s237_s0, 4  ;;  %s24_s20 = int_to_ptr.vmem [resolvable:$true] %s23_s20 }
  0x13   :  { %s165_s21 = scalar_lea.vmem %s24_s20, 256  ;;  %p170_p6 = scmp.lt.s32.totalorder %s24_s20, %s24_s20 }
  0x14   :  { %p166_p5 = scmp.ne.s32.totalorder %s24_s20, %s165_s21  ;;  %p171_p7 = scmp.lt.s32.totalorder %s165_s21, %s165_s21 }
  0x16   :  { %p172_p8 = por %p171_p7, %p170_p6 }
  0x18   :  { %p173_p9 = pnand %p172_p8, %p166_p5 }
  0x1a   :  { %176 = shalt.err (!%p173_p9)
}
  0x1b   :  { %s238_s1 = smov 128   ;;  %s239_s22 = smov 8  }
  0x1c   :  { %29 = dma.hbm_to_vmem [thread:$0]  %s291_s2, 256, %s24_s20, [#allocation6], %s238_s1, %s238_s1, %s239_s22  }
  0x1d   :  { %215 = dma.done.wait [#allocation6], 256  }
  0x1e   :  { %216 = vsyncadd [#allocation6], 4294967040  ;;  %s273_s25 = smov 0  }
  0x1f LB: > { %s41_s26 = sld [smem:[#allocation4 + %s221_s25]]  ;;  %v231_v0 = vmov 0.0   ;;  %s221_s25 = sphi %s273_s25, %s38_s25  }
  0x25   : > { %p96_p10 = scmp.le.s32.totalorder %s41_s26, 0 }
  0x26   : > { %s227_s27 = smov (!%p96_p10), 0  }
  0x27   : > { %86 = sbr.rel (%p96_p10) target bundleno = 59 (0x3b), region = 38 }
  0x2c   : > { %v223_v1 = vmov 0.0  }
  0x2d LB: >> { %s49_s2 = smul.u32 7, %s221_s25  ;;  %s229_s27 = sphi %s227_s27, %s45_s27   ;;  %v225_v1 = vphi %v223_v1, %v224_v1  }
  0x2f   : >> { %s50_s28 = sadd.s32 %s229_s27, %s49_s2  ;;  %s45_s27 = sadd.s32 1, %s229_s27  }
  0x30   : >> { %s51_s29 = sld [smem:[#allocation3 + %s50_s28]]  ;;  %p44_p11 = scmp.ge.s32.totalorder %s45_s27, %s41_s26 }
  0x36   : >> { %s52_s30 = scalar_lea.vmem [#allocation5], %s51_s29  ;;  %47 = sbr.rel (!%p44_p11) target bundleno = 45 (0x2d), region = 44 }
  0x37   : >> { %v53_v2 = vld [vmem:[%s52_s30] sm:$0x1] }
  0x38   : >> { %v54_v3 = vadd.f32 %v225_v1, %v53_v2  }
  0x3a   : >> { %v224_v1 = vmov %v54_v3   ;;  %v232_v0 = vmov (%p44_p11), %v54_v3  }
  0x3b PF: > { %p55_p12 = scmp.gt.s32.totalorder %s41_s26, 1  ;;  %vm62_vm0 = vcmask 253952   ;;  %s61_s5 = scalar_lea.vmem [#allocation8], %s221_s25  ;;  %v233_v0 = vphi %v231_v0, %v232_v0  }
  0x3c   : > { %s38_s25 = sadd.s32 1, %s221_s25  }
  0x3d   : > { %s295_s26 = smov (!%p55_p12, %s41_s26), 1  ;;  %p35_p13 = scmp.ge.s32.totalorder %s38_s25, 16  }
  0x3e   : > { %s57_s4 = scvt.s32.f32 %s295_s26  ;;  %s240_s6 = smov (%p35_p13), [#allocation8]  }
  0x3f   :  { %s69_s7 = sshll.u32 (%p35_p13), %s240_s6, 4  ;;  %s70_s7 = int_to_ptr.vmem [resolvable:$true] %s69_s7 }
  0x40   : > { %v58_v4 = vstv %s57_s4  ;;  %s177_s8 = scalar_lea.vmem (%p35_p13), %s70_s7, 256  ;;  %p182_p1 = scmp.lt.s32.totalorder (%p35_p13), %s70_s7, %s70_s7 }
  0x41   : > { %135 = vrcp.f32 %v58_v4  ;;  %p178_p0 = scmp.ne.s32.totalorder (%p35_p13), %s70_s7, %s177_s8  ;;  %p183_p2 = scmp.lt.s32.totalorder (%p35_p13), %s177_s8, %s177_s8 }
  0x43   :  { %p184_p3 = por (%p35_p13), %p183_p2, %p182_p1 }
  0x45   :  { %p185_p4 = pnand (%p35_p13), %p184_p3, %p178_p0 }
  0x4d   :  { %37 = sbr.rel (!%p35_p13) target bundleno = 31 (0x1f), region = 55 }
  0x4e   : > { %v136_v5 = vpop.eup %135 }
  0x4f   : > { %v60_v6 = vmul.f32 %v233_v0, %v136_v5 }
  0x51   : > { %63 = vst.msk [vmem:[%s61_s5] sm:$0x1] %vm62_vm0, %v60_v6 }
  0x52   :  { %188 = shalt.err (!%p185_p4)
}
  0x53   :  { %75 = dma.vmem_to_hbm [thread:$0]  %s70_s7, 256, %s292_s3, [#allocation7], %s238_s1, %s238_s1, %s239_s22  }
  0x54   :  { %217 = dma.done.wait [#allocation7], 256  }
  0x55   :  { %218 = vsyncadd [#allocation7], 4294967040 }
  0x56   :  { %79 = vsyncpa [#allocation6], 1 }
  0x57   :  { %80 = vsyncpa [#allocation7], 1 }

</bundles_post_ra>
